<compile_context>
chip_gen: v7x
topology: tpu7x:2x2x1
jax: 0.10.0
libtpu: 0.0.40
codegen_flags: <defaults>
</compile_context>

<pallas_src>
import functools

import jax
import jax.numpy as jnp
from jax.experimental import pallas as pl
from jax.experimental.pallas import tpu as pltpu


def _round_up(x, m):
    return (x + m - 1) // m * m


def _pick_time_chunk(T, cap=32):
    """Largest divisor of T that is <= cap (chunk of time steps per grid step)."""
    tt = 1
    for d in range(1, min(T, cap) + 1):
        if T % d == 0:
            tt = d
    return tt


def _tbrnn_kernel(drive_ref, x0_ref, mn_ref, lT_ref, traj_ref, x_sc,
                  *, rank, one_minus_tau, tt):
    """One grid step advances the recurrence by `tt` time steps.

    drive_ref : (TT, Bp, Hp)  tau*(u@w_in^T + b_in) + noise_std*noise, time-major
    x0_ref    : (Bp, Hp)      initial state (resident)
    mn_ref    : (Hp, 2R)      [M | N] fused
    lT_ref    : (R, Hp)       (tau / H^2) * L^T (scale folded in)
    traj_ref  : (TT, Bp, Hp)  trajectory slab for this chunk
    x_sc      : (Bp, Hp)      recurrent state carried across grid steps (VMEM)
    """
    @pl.when(pl.program_id(0) == 0)
    def _():
        x_sc[...] = x0_ref[...]

    x = x_sc[...]
    mn = mn_ref[...]
    lT = lT_ref[...]

    # Static trip count -> fully unrolled, all ref indices static.
    for i in range(tt):
        r = jnp.tanh(x)                                              # form == 'rate'
        rmn = jnp.dot(r, mn, preferred_element_type=jnp.float32)     # (Bp, 2R)
        prod = rmn[:, :rank] * rmn[:, rank:]                         # (r@M)*(r@N)
        hidden = jnp.dot(prod, lT, preferred_element_type=jnp.float32)  # tau/H^2 folded
        x = one_minus_tau * x + drive_ref[i] + hidden                # Euler update
        traj_ref[i, :, :] = x

    x_sc[...] = x


def low_rank_tbrnn_forward(u, x0, noise, params, *, noise_std=0.05, tau=0.2):
    """u: (B, T, I), x0: (B, H) or None, noise: (T, B, H).

    Returns (output, x, trajectories) matching the PyTorch module
    (rate form, continuous mode, hard_orth=False).
    """
    B, T, I = u.shape
    H = params["w_in"].shape[0]
    R = params["L"].shape[1]
    f32 = jnp.float32

    if x0 is None:
        x0 = jnp.zeros((B, H), f32)

    # ---- hoisted precompute (one big XLA matmul, no recurrence dependency) ----
    u_tm = jnp.transpose(u, (1, 0, 2)).astype(f32)                      # (T, B, I)
    w_in_T = params["w_in"].T.astype(f32)                               # (I, H)
    b_in = params["b_in"].astype(f32)
    input_I = (u_tm.reshape(T * B, I) @ w_in_T).reshape(T, B, H) + b_in
    drive = tau * input_I + noise_std * noise.astype(f32)               # (T, B, H)

    # ---- pad to sublane/lane granularity (padded rows/lanes stay zero) ----
    Bp = _round_up(B, 8)
    Hp = _round_up(H, 128)
    drive_p = jnp.pad(drive, ((0, 0), (0, Bp - B), (0, Hp - H)))
    x0_p = jnp.pad(x0.astype(f32), ((0, Bp - B), (0, Hp - H)))
    mn_p = jnp.pad(
        jnp.concatenate([params["M"], params["N"]], axis=1).astype(f32),
        ((0, Hp - H), (0, 0)))                                          # (Hp, 2R)
    lT_p = jnp.pad((tau / float(H ** 2)) * params["L"].T.astype(f32),
                   ((0, 0), (0, Hp - H)))                               # (R, Hp)

    TT = _pick_time_chunk(T)
    kernel = functools.partial(_tbrnn_kernel, rank=R,
                               one_minus_tau=float(1.0 - tau), tt=TT)

    traj_p = pl.pallas_call(
        kernel,
        out_shape=jax.ShapeDtypeStruct((T, Bp, Hp), f32),
        grid_spec=pltpu.PrefetchScalarGridSpec(
            num_scalar_prefetch=0,
            grid=(T // TT,),
            in_specs=[
                pl.BlockSpec((TT, Bp, Hp), lambda c: (c, 0, 0)),   # drive (time-chunked)
                pl.BlockSpec((Bp, Hp), lambda c: (0, 0)),          # x0 (resident)
                pl.BlockSpec((Hp, 2 * R), lambda c: (0, 0)),       # [M|N] (resident)
                pl.BlockSpec((R, Hp), lambda c: (0, 0)),           # scaled L^T (resident)
            ],
            out_specs=pl.BlockSpec((TT, Bp, Hp), lambda c: (c, 0, 0)),
            scratch_shapes=[pltpu.VMEM((Bp, Hp), f32)],            # recurrent state
        ),
        compiler_params=pltpu.CompilerParams(
            dimension_semantics=("arbitrary",)),                   # time is sequential
    )(drive_p, x0_p, mn_p, lT_p)

    traj_tm = traj_p[:, :B, :H]                                    # (T, B, H)
    trajectories = jnp.transpose(traj_tm, (1, 0, 2))               # (B, T, H)
    x_final = trajectories[:, -1, :]                               # state after last step

    # ---- hoisted output projection: one big lane-dense matmul ----
    w_out_T = params["w_out"].T.astype(f32)
    b_out = params["b_out"].astype(f32)
    output = jnp.tanh(trajectories) @ w_out_T + b_out              # (B, T, O)
    return output, x_final, trajectories


def _ref_forward(u, x0, noise, p, H, noise_std=0.05, tau=0.2):
    """Pure-JAX reference matching the PyTorch forward (rate / cont / soft-orth)."""
    x = x0
    trajs = []
    for t in range(u.shape[1]):
        u_t = u[:, t, :]
        r = jnp.tanh(x)
        input_I = u_t @ p["w_in"].T + p["b_in"]
        hidden_W = ((r @ p["M"]) * (r @ p["N"])) @ p["L"].T / float(H ** 2)
        rec_x = hidden_W + input_I
        x = x + noise_std * noise[t] + tau * (-x + rec_x)
        trajs.append(x)
    traj = jnp.stack(trajs, axis=1)
    out = jnp.tanh(traj) @ p["w_out"].T + p["b_out"]
    return out, x, traj


if __name__ == "__main__":
    B, T, I, H, O, R = 2, 8, 4, 32, 3, 1   # batch, seq, input_size, hidden_dim, output_size, rank

    key = jax.random.PRNGKey(0)
    keys = jax.random.split(key, 9)

    def xavier_uniform(k, shape):
        fan_out, fan_in = shape           # PyTorch convention for 2-D tensors
        lim = (6.0 / (fan_in + fan_out)) ** 0.5
        return jax.random.uniform(k, shape, jnp.float32, -lim, lim)

    params = {
        "L": xavier_uniform(keys[0], (H, R)),
        "M": xavier_uniform(keys[1], (H, R)),
        "N": xavier_uniform(keys[2], (H, R)),
        "w_in": xavier_uniform(keys[3], (H, I)),
        "b_in": jax.random.uniform(keys[4], (H,), jnp.float32,
                                   -1.0 / I ** 0.5, 1.0 / I ** 0.5),
        "w_out": xavier_uniform(keys[5], (O, H)),
        "b_out": jax.random.uniform(keys[6], (O,), jnp.float32,
                                    -1.0 / H ** 0.5, 1.0 / H ** 0.5),
    }

    u = jax.random.normal(keys[7], (B, T, I), jnp.float32)
    x0 = jnp.zeros((B, H), jnp.float32)
    # torch.randn(seq, b, hid) equivalent, generated deterministically and fed in
    noise = jax.random.normal(keys[8], (T, B, H), jnp.float32)

    out, x_final, traj = low_rank_tbrnn_forward(u, x0, noise, params)
    (out, x_final, traj) = jax.block_until_ready((out, x_final, traj))

    out_r, x_r, traj_r = _ref_forward(u, x0, noise, params, H)
    assert jnp.allclose(out, out_r, atol=1e-4, rtol=1e-4)
    assert jnp.allclose(x_final, x_r, atol=1e-4, rtol=1e-4)
    assert jnp.allclose(traj, traj_r, atol=1e-4, rtol=1e-4)

    print("KERNEL_OK")
</pallas_src>

<mosaic_0001>
module attributes {stable_mosaic.version = 11 : i64} {
  func.func @_tbrnn_kernel(%arg0: i32, %arg1: memref<8x8x128xf32, #tpu.memory_space<vmem>>, %arg2: memref<8x128xf32, #tpu.memory_space<vmem>>, %arg3: memref<128x2xf32, #tpu.memory_space<vmem>>, %arg4: memref<1x128xf32, #tpu.memory_space<vmem>>, %arg5: memref<8x8x128xf32, #tpu.memory_space<vmem>>, %arg6: memref<8x128xf32, #tpu.memory_space<vmem>>) attributes {dimension_semantics = [#tpu.dimension_semantics<arbitrary>], iteration_bounds = array<i64: 1>, scalar_prefetch = 0 : i64, scratch_operands = 1 : i64, tpu.core_type = #tpu.core_type<tc>, window_params = [{transform_indices = @transform_0, window_bounds = array<i64: 8, 8, 128>}, {pipeline_mode = #tpu.pipeline_mode<synchronous>, transform_indices = @transform_1, window_bounds = array<i64: 8, 128>}, {pipeline_mode = #tpu.pipeline_mode<synchronous>, transform_indices = @transform_2, window_bounds = array<i64: 128, 2>}, {pipeline_mode = #tpu.pipeline_mode<synchronous>, transform_indices = @transform_3, window_bounds = array<i64: 1, 128>}, {transform_indices = @transform_4, window_bounds = array<i64: 8, 8, 128>}]} {
    %c0_i32 = arith.constant 0 : i32
    %0 = arith.cmpi eq, %arg0, %c0_i32 : i32
    %1 = arith.extui %0 : i1 to i32
    %c0_i32_0 = arith.constant 0 : i32
    %2 = arith.cmpi ne, %1, %c0_i32_0 : i32
    scf.if %2 {
      %c0_72 = arith.constant 0 : index
      %c0_73 = arith.constant 0 : index
      %127 = vector.load %arg2[%c0_72, %c0_73] : memref<8x128xf32, #tpu.memory_space<vmem>>, vector<8x128xf32>
      %c0_74 = arith.constant 0 : index
      %c0_75 = arith.constant 0 : index
      %128 = vector.load %arg6[%c0_74, %c0_75] : memref<8x128xf32, #tpu.memory_space<vmem>>, vector<8x128xf32>
      tpu.vector_store %arg6[%c0_74, %c0_75], %127 {strides = array<i32>} : memref<8x128xf32, #tpu.memory_space<vmem>>, vector<8x128xf32>,
    } else {
    }
    %c0 = arith.constant 0 : index
    %c0_1 = arith.constant 0 : index
    %3 = vector.load %arg6[%c0, %c0_1] : memref<8x128xf32, #tpu.memory_space<vmem>>, vector<8x128xf32>
    %c0_2 = arith.constant 0 : index
    %c0_3 = arith.constant 0 : index
    %4 = vector.load %arg3[%c0_2, %c0_3] : memref<128x2xf32, #tpu.memory_space<vmem>>, vector<128x2xf32>
    %c0_4 = arith.constant 0 : index
    %c0_5 = arith.constant 0 : index
    %5 = vector.load %arg4[%c0_4, %c0_5] : memref<1x128xf32, #tpu.memory_space<vmem>>, vector<1x128xf32>
    %6 = math.tanh %3 : vector<8x128xf32>
    %cst = arith.constant dense<0.000000e+00> : vector<8x2xf32>
    %7 = tpu.matmul %6, %4, %cst {dimension_numbers = #tpu.dot_dimension_numbers<[1], [0], [0], [1], [0, 0, 1, 1], [], []>} : vector<8x128xf32>, vector<128x2xf32>, vector<8x2xf32> -> vector<8x2xf32>
    %8 = vector.extract_strided_slice %7 {offsets = [0, 0], sizes = [8, 1], strides = [1, 1]} : vector<8x2xf32> to vector<8x1xf32>
    %9 = vector.extract_strided_slice %7 {offsets = [0, 1], sizes = [8, 1], strides = [1, 1]} : vector<8x2xf32> to vector<8x1xf32>
    %10 = arith.mulf %8, %9 : vector<8x1xf32>
    %cst_6 = arith.constant dense<0.000000e+00> : vector<8x128xf32>
    %11 = tpu.matmul %10, %5, %cst_6 {dimension_numbers = #tpu.dot_dimension_numbers<[1], [0], [0], [1], [0, 0, 1, 1], [], []>} : vector<8x1xf32>, vector<1x128xf32>, vector<8x128xf32> -> vector<8x128xf32>
    %cst_7 = arith.constant 8.000000e-01 : f32
    %12 = vector.broadcast %cst_7 : f32 to vector<8x128xf32>
    %13 = arith.mulf %12, %3 : vector<8x128xf32>
    %c0_8 = arith.constant 0 : index
    %c0_9 = arith.constant 0 : index
    %c0_10 = arith.constant 0 : index
    %14 = vector.load %arg1[%c0_8, %c0_9, %c0_10] : memref<8x8x128xf32, #tpu.memory_space<vmem>>, vector<1x8x128xf32>
    %15 = vector.shape_cast %14 : vector<1x8x128xf32> to vector<8x128xf32>
    %16 = arith.addf %13, %15 : vector<8x128xf32>
    %17 = arith.addf %16, %11 : vector<8x128xf32>
    %c0_11 = arith.constant 0 : index
    %c0_12 = arith.constant 0 : index
    %c0_13 = arith.constant 0 : index
    %18 = vector.load %arg5[%c0_11, %c0_12, %c0_13] : memref<8x8x128xf32, #tpu.memory_space<vmem>>, vector<1x8x128xf32>
    %19 = vector.shape_cast %18 : vector<1x8x128xf32> to vector<8x128xf32>
    %20 = vector.shape_cast %17 : vector<8x128xf32> to vector<1x8x128xf32>
    tpu.vector_store %arg5[%c0_11, %c0_12, %c0_13], %20 {strides = array<i32>} : memref<8x8x128xf32, #tpu.memory_space<vmem>>, vector<1x8x128xf32>,
    %21 = math.tanh %17 : vector<8x128xf32>
    %cst_14 = arith.constant dense<0.000000e+00> : vector<8x2xf32>
    %22 = tpu.matmul %21, %4, %cst_14 {dimension_numbers = #tpu.dot_dimension_numbers<[1], [0], [0], [1], [0, 0, 1, 1], [], []>} : vector<8x128xf32>, vector<128x2xf32>, vector<8x2xf32> -> vector<8x2xf32>
    %23 = vector.extract_strided_slice %22 {offsets = [0, 0], sizes = [8, 1], strides = [1, 1]} : vector<8x2xf32> to vector<8x1xf32>
    %24 = vector.extract_strided_slice %22 {offsets = [0, 1], sizes = [8, 1], strides = [1, 1]} : vector<8x2xf32> to vector<8x1xf32>
    %25 = arith.mulf %23, %24 : vector<8x1xf32>
    %cst_15 = arith.constant dense<0.000000e+00> : vector<8x128xf32>
    %26 = tpu.matmul %25, %5, %cst_15 {dimension_numbers = #tpu.dot_dimension_numbers<[1], [0], [0], [1], [0, 0, 1, 1], [], []>} : vector<8x1xf32>, vector<1x128xf32>, vector<8x128xf32> -> vector<8x128xf32>
    %cst_16 = arith.constant 8.000000e-01 : f32
    %27 = vector.broadcast %cst_16 : f32 to vector<8x128xf32>
    %28 = arith.mulf %27, %17 : vector<8x128xf32>
    %c1 = arith.constant 1 : index
    %c0_17 = arith.constant 0 : index
    %c0_18 = arith.constant 0 : index
    %29 = vector.load %arg1[%c1, %c0_17, %c0_18] : memref<8x8x128xf32, #tpu.memory_space<vmem>>, vector<1x8x128xf32>
    %30 = vector.shape_cast %29 : vector<1x8x128xf32> to vector<8x128xf32>
    %31 = arith.addf %28, %30 : vector<8x128xf32>
    %32 = arith.addf %31, %26 : vector<8x128xf32>
    %c1_19 = arith.constant 1 : index
    %c0_20 = arith.constant 0 : index
    %c0_21 = arith.constant 0 : index
    %33 = vector.load %arg5[%c1_19, %c0_20, %c0_21] : memref<8x8x128xf32, #tpu.memory_space<vmem>>, vector<1x8x128xf32>
    %34 = vector.shape_cast %33 : vector<1x8x128xf32> to vector<8x128xf32>
    %35 = vector.shape_cast %32 : vector<8x128xf32> to vector<1x8x128xf32>
    tpu.vector_store %arg5[%c1_19, %c0_20, %c0_21], %35 {strides = array<i32>} : memref<8x8x128xf32, #tpu.memory_space<vmem>>, vector<1x8x128xf32>,
    %36 = math.tanh %32 : vector<8x128xf32>
    %cst_22 = arith.constant dense<0.000000e+00> : vector<8x2xf32>
    %37 = tpu.matmul %36, %4, %cst_22 {dimension_numbers = #tpu.dot_dimension_numbers<[1], [0], [0], [1], [0, 0, 1, 1], [], []>} : vector<8x128xf32>, vector<128x2xf32>, vector<8x2xf32> -> vector<8x2xf32>
    %38 = vector.extract_strided_slice %37 {offsets = [0, 0], sizes = [8, 1], strides = [1, 1]} : vector<8x2xf32> to vector<8x1xf32>
    %39 = vector.extract_strided_slice %37 {offsets = [0, 1], sizes = [8, 1], strides = [1, 1]} : vector<8x2xf32> to vector<8x1xf32>
    %40 = arith.mulf %38, %39 : vector<8x1xf32>
    %cst_23 = arith.constant dense<0.000000e+00> : vector<8x128xf32>
    %41 = tpu.matmul %40, %5, %cst_23 {dimension_numbers = #tpu.dot_dimension_numbers<[1], [0], [0], [1], [0, 0, 1, 1], [], []>} : vector<8x1xf32>, vector<1x128xf32>, vector<8x128xf32> -> vector<8x128xf32>
    %cst_24 = arith.constant 8.000000e-01 : f32
    %42 = vector.broadcast %cst_24 : f32 to vector<8x128xf32>
    %43 = arith.mulf %42, %32 : vector<8x128xf32>
    %c2 = arith.constant 2 : index
    %c0_25 = arith.constant 0 : index
    %c0_26 = arith.constant 0 : index
    %44 = vector.load %arg1[%c2, %c0_25, %c0_26] : memref<8x8x128xf32, #tpu.memory_space<vmem>>, vector<1x8x128xf32>
    %45 = vector.shape_cast %44 : vector<1x8x128xf32> to vector<8x128xf32>
    %46 = arith.addf %43, %45 : vector<8x128xf32>
    %47 = arith.addf %46, %41 : vector<8x128xf32>
    %c2_27 = arith.constant 2 : index
    %c0_28 = arith.constant 0 : index
    %c0_29 = arith.constant 0 : index
    %48 = vector.load %arg5[%c2_27, %c0_28, %c0_29] : memref<8x8x128xf32, #tpu.memory_space<vmem>>, vector<1x8x128xf32>
    %49 = vector.shape_cast %48 : vector<1x8x128xf32> to vector<8x128xf32>
    %50 = vector.shape_cast %47 : vector<8x128xf32> to vector<1x8x128xf32>
    tpu.vector_store %arg5[%c2_27, %c0_28, %c0_29], %50 {strides = array<i32>} : memref<8x8x128xf32, #tpu.memory_space<vmem>>, vector<1x8x128xf32>,
    %51 = math.tanh %47 : vector<8x128xf32>
    %cst_30 = arith.constant dense<0.000000e+00> : vector<8x2xf32>
    %52 = tpu.matmul %51, %4, %cst_30 {dimension_numbers = #tpu.dot_dimension_numbers<[1], [0], [0], [1], [0, 0, 1, 1], [], []>} : vector<8x128xf32>, vector<128x2xf32>, vector<8x2xf32> -> vector<8x2xf32>
    %53 = vector.extract_strided_slice %52 {offsets = [0, 0], sizes = [8, 1], strides = [1, 1]} : vector<8x2xf32> to vector<8x1xf32>
    %54 = vector.extract_strided_slice %52 {offsets = [0, 1], sizes = [8, 1], strides = [1, 1]} : vector<8x2xf32> to vector<8x1xf32>
    %55 = arith.mulf %53, %54 : vector<8x1xf32>
    %cst_31 = arith.constant dense<0.000000e+00> : vector<8x128xf32>
    %56 = tpu.matmul %55, %5, %cst_31 {dimension_numbers = #tpu.dot_dimension_numbers<[1], [0], [0], [1], [0, 0, 1, 1], [], []>} : vector<8x1xf32>, vector<1x128xf32>, vector<8x128xf32> -> vector<8x128xf32>
    %cst_32 = arith.constant 8.000000e-01 : f32
    %57 = vector.broadcast %cst_32 : f32 to vector<8x128xf32>
    %58 = arith.mulf %57, %47 : vector<8x128xf32>
    %c3 = arith.constant 3 : index
    %c0_33 = arith.constant 0 : index
    %c0_34 = arith.constant 0 : index
    %59 = vector.load %arg1[%c3, %c0_33, %c0_34] : memref<8x8x128xf32, #tpu.memory_space<vmem>>, vector<1x8x128xf32>
    %60 = vector.shape_cast %59 : vector<1x8x128xf32> to vector<8x128xf32>
    %61 = arith.addf %58, %60 : vector<8x128xf32>
    %62 = arith.addf %61, %56 : vector<8x128xf32>
    %c3_35 = arith.constant 3 : index
    %c0_36 = arith.constant 0 : index
    %c0_37 = arith.constant 0 : index
    %63 = vector.load %arg5[%c3_35, %c0_36, %c0_37] : memref<8x8x128xf32, #tpu.memory_space<vmem>>, vector<1x8x128xf32>
    %64 = vector.shape_cast %63 : vector<1x8x128xf32> to vector<8x128xf32>
    %65 = vector.shape_cast %62 : vector<8x128xf32> to vector<1x8x128xf32>
    tpu.vector_store %arg5[%c3_35, %c0_36, %c0_37], %65 {strides = array<i32>} : memref<8x8x128xf32, #tpu.memory_space<vmem>>, vector<1x8x128xf32>,
    %66 = math.tanh %62 : vector<8x128xf32>
    %cst_38 = arith.constant dense<0.000000e+00> : vector<8x2xf32>
    %67 = tpu.matmul %66, %4, %cst_38 {dimension_numbers = #tpu.dot_dimension_numbers<[1], [0], [0], [1], [0, 0, 1, 1], [], []>} : vector<8x128xf32>, vector<128x2xf32>, vector<8x2xf32> -> vector<8x2xf32>
    %68 = vector.extract_strided_slice %67 {offsets = [0, 0], sizes = [8, 1], strides = [1, 1]} : vector<8x2xf32> to vector<8x1xf32>
    %69 = vector.extract_strided_slice %67 {offsets = [0, 1], sizes = [8, 1], strides = [1, 1]} : vector<8x2xf32> to vector<8x1xf32>
    %70 = arith.mulf %68, %69 : vector<8x1xf32>
    %cst_39 = arith.constant dense<0.000000e+00> : vector<8x128xf32>
    %71 = tpu.matmul %70, %5, %cst_39 {dimension_numbers = #tpu.dot_dimension_numbers<[1], [0], [0], [1], [0, 0, 1, 1], [], []>} : vector<8x1xf32>, vector<1x128xf32>, vector<8x128xf32> -> vector<8x128xf32>
    %cst_40 = arith.constant 8.000000e-01 : f32
    %72 = vector.broadcast %cst_40 : f32 to vector<8x128xf32>
    %73 = arith.mulf %72, %62 : vector<8x128xf32>
    %c4 = arith.constant 4 : index
    %c0_41 = arith.constant 0 : index
    %c0_42 = arith.constant 0 : index
    %74 = vector.load %arg1[%c4, %c0_41, %c0_42] : memref<8x8x128xf32, #tpu.memory_space<vmem>>, vector<1x8x128xf32>
    %75 = vector.shape_cast %74 : vector<1x8x128xf32> to vector<8x128xf32>
    %76 = arith.addf %73, %75 : vector<8x128xf32>
    %77 = arith.addf %76, %71 : vector<8x128xf32>
    %c4_43 = arith.constant 4 : index
    %c0_44 = arith.constant 0 : index
    %c0_45 = arith.constant 0 : index
    %78 = vector.load %arg5[%c4_43, %c0_44, %c0_45] : memref<8x8x128xf32, #tpu.memory_space<vmem>>, vector<1x8x128xf32>
    %79 = vector.shape_cast %78 : vector<1x8x128xf32> to vector<8x128xf32>
    %80 = vector.shape_cast %77 : vector<8x128xf32> to vector<1x8x128xf32>
    tpu.vector_store %arg5[%c4_43, %c0_44, %c0_45], %80 {strides = array<i32>} : memref<8x8x128xf32, #tpu.memory_space<vmem>>, vector<1x8x128xf32>,
    %81 = math.tanh %77 : vector<8x128xf32>
    %cst_46 = arith.constant dense<0.000000e+00> : vector<8x2xf32>
    %82 = tpu.matmul %81, %4, %cst_46 {dimension_numbers = #tpu.dot_dimension_numbers<[1], [0], [0], [1], [0, 0, 1, 1], [], []>} : vector<8x128xf32>, vector<128x2xf32>, vector<8x2xf32> -> vector<8x2xf32>
    %83 = vector.extract_strided_slice %82 {offsets = [0, 0], sizes = [8, 1], strides = [1, 1]} : vector<8x2xf32> to vector<8x1xf32>
    %84 = vector.extract_strided_slice %82 {offsets = [0, 1], sizes = [8, 1], strides = [1, 1]} : vector<8x2xf32> to vector<8x1xf32>
    %85 = arith.mulf %83, %84 : vector<8x1xf32>
    %cst_47 = arith.constant dense<0.000000e+00> : vector<8x128xf32>
    %86 = tpu.matmul %85, %5, %cst_47 {dimension_numbers = #tpu.dot_dimension_numbers<[1], [0], [0], [1], [0, 0, 1, 1], [], []>} : vector<8x1xf32>, vector<1x128xf32>, vector<8x128xf32> -> vector<8x128xf32>
    %cst_48 = arith.constant 8.000000e-01 : f32
    %87 = vector.broadcast %cst_48 : f32 to vector<8x128xf32>
    %88 = arith.mulf %87, %77 : vector<8x128xf32>
    %c5 = arith.constant 5 : index
    %c0_49 = arith.constant 0 : index
    %c0_50 = arith.constant 0 : index
    %89 = vector.load %arg1[%c5, %c0_49, %c0_50] : memref<8x8x128xf32, #tpu.memory_space<vmem>>, vector<1x8x128xf32>
    %90 = vector.shape_cast %89 : vector<1x8x128xf32> to vector<8x128xf32>
    %91 = arith.addf %88, %90 : vector<8x128xf32>
    %92 = arith.addf %91, %86 : vector<8x128xf32>
    %c5_51 = arith.constant 5 : index
    %c0_52 = arith.constant 0 : index
    %c0_53 = arith.constant 0 : index
    %93 = vector.load %arg5[%c5_51, %c0_52, %c0_53] : memref<8x8x128xf32, #tpu.memory_space<vmem>>, vector<1x8x128xf32>
    %94 = vector.shape_cast %93 : vector<1x8x128xf32> to vector<8x128xf32>
    %95 = vector.shape_cast %92 : vector<8x128xf32> to vector<1x8x128xf32>
    tpu.vector_store %arg5[%c5_51, %c0_52, %c0_53], %95 {strides = array<i32>} : memref<8x8x128xf32, #tpu.memory_space<vmem>>, vector<1x8x128xf32>,
    %96 = math.tanh %92 : vector<8x128xf32>
    %cst_54 = arith.constant dense<0.000000e+00> : vector<8x2xf32>
    %97 = tpu.matmul %96, %4, %cst_54 {dimension_numbers = #tpu.dot_dimension_numbers<[1], [0], [0], [1], [0, 0, 1, 1], [], []>} : vector<8x128xf32>, vector<128x2xf32>, vector<8x2xf32> -> vector<8x2xf32>
    %98 = vector.extract_strided_slice %97 {offsets = [0, 0], sizes = [8, 1], strides = [1, 1]} : vector<8x2xf32> to vector<8x1xf32>
    %99 = vector.extract_strided_slice %97 {offsets = [0, 1], sizes = [8, 1], strides = [1, 1]} : vector<8x2xf32> to vector<8x1xf32>
    %100 = arith.mulf %98, %99 : vector<8x1xf32>
    %cst_55 = arith.constant dense<0.000000e+00> : vector<8x128xf32>
    %101 = tpu.matmul %100, %5, %cst_55 {dimension_numbers = #tpu.dot_dimension_numbers<[1], [0], [0], [1], [0, 0, 1, 1], [], []>} : vector<8x1xf32>, vector<1x128xf32>, vector<8x128xf32> -> vector<8x128xf32>
    %cst_56 = arith.constant 8.000000e-01 : f32
    %102 = vector.broadcast %cst_56 : f32 to vector<8x128xf32>
    %103 = arith.mulf %102, %92 : vector<8x128xf32>
    %c6 = arith.constant 6 : index
    %c0_57 = arith.constant 0 : index
    %c0_58 = arith.constant 0 : index
    %104 = vector.load %arg1[%c6, %c0_57, %c0_58] : memref<8x8x128xf32, #tpu.memory_space<vmem>>, vector<1x8x128xf32>
    %105 = vector.shape_cast %104 : vector<1x8x128xf32> to vector<8x128xf32>
    %106 = arith.addf %103, %105 : vector<8x128xf32>
    %107 = arith.addf %106, %101 : vector<8x128xf32>
    %c6_59 = arith.constant 6 : index
    %c0_60 = arith.constant 0 : index
    %c0_61 = arith.constant 0 : index
    %108 = vector.load %arg5[%c6_59, %c0_60, %c0_61] : memref<8x8x128xf32, #tpu.memory_space<vmem>>, vector<1x8x128xf32>
    %109 = vector.shape_cast %108 : vector<1x8x128xf32> to vector<8x128xf32>
    %110 = vector.shape_cast %107 : vector<8x128xf32> to vector<1x8x128xf32>
    tpu.vector_store %arg5[%c6_59, %c0_60, %c0_61], %110 {strides = array<i32>} : memref<8x8x128xf32, #tpu.memory_space<vmem>>, vector<1x8x128xf32>,
    %111 = math.tanh %107 : vector<8x128xf32>
    %cst_62 = arith.constant dense<0.000000e+00> : vector<8x2xf32>
    %112 = tpu.matmul %111, %4, %cst_62 {dimension_numbers = #tpu.dot_dimension_numbers<[1], [0], [0], [1], [0, 0, 1, 1], [], []>} : vector<8x128xf32>, vector<128x2xf32>, vector<8x2xf32> -> vector<8x2xf32>
    %113 = vector.extract_strided_slice %112 {offsets = [0, 0], sizes = [8, 1], strides = [1, 1]} : vector<8x2xf32> to vector<8x1xf32>
    %114 = vector.extract_strided_slice %112 {offsets = [0, 1], sizes = [8, 1], strides = [1, 1]} : vector<8x2xf32> to vector<8x1xf32>
    %115 = arith.mulf %113, %114 : vector<8x1xf32>
    %cst_63 = arith.constant dense<0.000000e+00> : vector<8x128xf32>
    %116 = tpu.matmul %115, %5, %cst_63 {dimension_numbers = #tpu.dot_dimension_numbers<[1], [0], [0], [1], [0, 0, 1, 1], [], []>} : vector<8x1xf32>, vector<1x128xf32>, vector<8x128xf32> -> vector<8x128xf32>
    %cst_64 = arith.constant 8.000000e-01 : f32
    %117 = vector.broadcast %cst_64 : f32 to vector<8x128xf32>
    %118 = arith.mulf %117, %107 : vector<8x128xf32>
    %c7 = arith.constant 7 : index
    %c0_65 = arith.constant 0 : index
    %c0_66 = arith.constant 0 : index
    %119 = vector.load %arg1[%c7, %c0_65, %c0_66] : memref<8x8x128xf32, #tpu.memory_space<vmem>>, vector<1x8x128xf32>
    %120 = vector.shape_cast %119 : vector<1x8x128xf32> to vector<8x128xf32>
    %121 = arith.addf %118, %120 : vector<8x128xf32>
    %122 = arith.addf %121, %116 : vector<8x128xf32>
    %c7_67 = arith.constant 7 : index
    %c0_68 = arith.constant 0 : index
    %c0_69 = arith.constant 0 : index
    %123 = vector.load %arg5[%c7_67, %c0_68, %c0_69] : memref<8x8x128xf32, #tpu.memory_space<vmem>>, vector<1x8x128xf32>
    %124 = vector.shape_cast %123 : vector<1x8x128xf32> to vector<8x128xf32>
    %125 = vector.shape_cast %122 : vector<8x128xf32> to vector<1x8x128xf32>
    tpu.vector_store %arg5[%c7_67, %c0_68, %c0_69], %125 {strides = array<i32>} : memref<8x8x128xf32, #tpu.memory_space<vmem>>, vector<1x8x128xf32>,
    %c0_70 = arith.constant 0 : index
    %c0_71 = arith.constant 0 : index
    %126 = vector.load %arg6[%c0_70, %c0_71] : memref<8x128xf32, #tpu.memory_space<vmem>>, vector<8x128xf32>
    tpu.vector_store %arg6[%c0_70, %c0_71], %122 {strides = array<i32>} : memref<8x128xf32, #tpu.memory_space<vmem>>, vector<8x128xf32>,
    return
  }
  func.func @transform_0(%arg0: i32) -> (i32, i32, i32) {
    %c0_i32 = arith.constant 0 : i32
    %c0_i32_0 = arith.constant 0 : i32
    %c0_i32_1 = arith.constant 0 : i32
    return %arg0, %c0_i32, %c0_i32_0 : i32, i32, i32
  }
  func.func @transform_1(%arg0: i32) -> (i32, i32) {
    %c0_i32 = arith.constant 0 : i32
    %c0_i32_0 = arith.constant 0 : i32
    %c0_i32_1 = arith.constant 0 : i32
    return %c0_i32, %c0_i32_0 : i32, i32
  }
  func.func @transform_2(%arg0: i32) -> (i32, i32) {
    %c0_i32 = arith.constant 0 : i32
    %c0_i32_0 = arith.constant 0 : i32
    %c0_i32_1 = arith.constant 0 : i32
    return %c0_i32, %c0_i32_0 : i32, i32
  }
  func.func @transform_3(%arg0: i32) -> (i32, i32) {
    %c0_i32 = arith.constant 0 : i32
    %c0_i32_0 = arith.constant 0 : i32
    %c0_i32_1 = arith.constant 0 : i32
    return %c0_i32, %c0_i32_0 : i32, i32
  }
  func.func @transform_4(%arg0: i32) -> (i32, i32, i32) {
    %c0_i32 = arith.constant 0 : i32
    %c0_i32_0 = arith.constant 0 : i32
    %c0_i32_1 = arith.constant 0 : i32
    return %arg0, %c0_i32, %c0_i32_0 : i32, i32, i32
  }
}

</mosaic_0001>

<bundles_post_ra>
// kernel: tpu_custom_call.1
= control target key start
LH: loop header
LB: loop body
LE: loop exit
PB: predicated region body
PF: predicated region fallthrough
CT: control target
= control target key end

     0   :  { %v2044_v3 = vmov 0.0|0.0   ;;  %vm2045_vm0 = vmmov 0   ;;  %v2046_v6 = vmov 0.0   ;;  %s2384_s0 = inlined_call_operand.vmem [shape: f32[8,8,128], index: 0, kind: input, shape index: {}]   ;;  %s2385_s1 = inlined_call_operand.vmem [shape: f32[8,128], index: 1, kind: input, shape index: {}]   ;;  %s2386_s2 = inlined_call_operand.vmem [shape: f32[128,2], index: 2, kind: input, shape index: {}]   ;;  %s2387_s3 = inlined_call_operand.vmem [shape: f32[1,128], index: 3, kind: input, shape index: {}]   ;;  %s2388_s4 = inlined_call_operand.hbm [shape: f32[8,8,128], index: 4, kind: output, shape index: {}]  }
   0x1   :  { %v25_v0 = vld [vmem:[%s2386_s2] sm:$0xff]  ;;  %v26_v1 = vld [vmem:[%s2386_s2 + $0x8] sm:$0xff]  ;;  %v27_v2 = vld [vmem:[%s2386_s2 + $0x10] sm:$0xff]  ;;  %1805 = vmatprep.subr.bf16.mxu0 %v2044_v3  ;;  %1517 = vmatprep.mubr.msk.f32.mxu0 %vm2045_vm0, %v2046_v6 }
   0x2   :  { %v2086_v4 = vpack.c.bf16 %v26_v1, %v25_v0  ;;  %v28_v5 = vld [vmem:[%s2386_s2 + $0x18] sm:$0xff]  ;;  %1520 = vmatprep.subr.mxu1 %v2046_v6  ;;  %1522 = vmatprep.mubr.msk.f32.mxu1 %vm2045_vm0, %v2046_v6  ;;  %v29_v8 = vld [vmem:[%s2386_s2 + $0x20] sm:$0xff]  ;;  %v30_v9 = vld [vmem:[%s2386_s2 + $0x28] sm:$0xff] }
   0x3   :  { %v2097_v7 = vpack.c.bf16 %v28_v5, %v27_v2 }
   0x4   :  { %1807 = vmatpush3.bf16.msra.mxu0 %v2086_v4 }
   0x5   :  { %1808 = vmatprep.subr.bf16.mxu0 %v2044_v3 }
   0x6   :  { %9 = vsyncpa [#allocation4], 0  ;;  %v2107_v10 = vpack.c.bf16 %v30_v9, %v29_v8  ;;  %v31_v11 = vld [vmem:[%s2386_s2 + $0x30] sm:$0xff]  ;;  %v32_v12 = vld [vmem:[%s2386_s2 + $0x38] sm:$0xff]  ;;  %vm122_vm1 = vcmask 1040384   ;;  %vm118_vm2 = vcmask 7168  }
   0x7   :  { %v2117_v13 = vpack.c.bf16 %v32_v12, %v31_v11  ;;  %v33_v14 = vld [vmem:[%s2386_s2 + $0x40] sm:$0xff]  ;;  %v34_v15 = vld [vmem:[%s2386_s2 + $0x48] sm:$0xff]  ;;  %v35_v17 = vld [vmem:[%s2386_s2 + $0x50] sm:$0xff]  ;;  %s2048_s13 = smov [#allocation3]  }
   0x8   :  { %1810 = vmatpush3.bf16.msra.mxu0 %v2097_v7  ;;  %v2127_v16 = vpack.c.bf16 %v34_v15, %v33_v14  ;;  %v36_v18 = vld [vmem:[%s2386_s2 + $0x58] sm:$0xff]  ;;  %v22_v19 = vld [vmem:[%s2385_s1] sm:$0xff]  ;;  %v38_v22 = vld [vmem:[%s2386_s2 + $0x68] sm:$0xff]  ;;  %s1299_s14 = sshll.u32 %s2048_s13, 4  ;;  %s1300_s14 = int_to_ptr.vmem [resolvable:$true] %s1299_s14 }
   0x9   :  { %1811 = vmatprep.subr.bf16.mxu0 %v2044_v3  ;;  %v2140_v20 = vpack.c.bf16 %v36_v18, %v35_v17  ;;  %v37_v21 = vld [vmem:[%s2386_s2 + $0x60] sm:$0xff]  ;;  %2004 = vtanh.f32 %v22_v19  ;;  %v39_v24 = vld [vmem:[%s2386_s2 + $0x70] sm:$0xff]  ;;  %v40_v25 = vld [vmem:[%s2386_s2 + $0x78] sm:$0xff]  ;;  %s2047_s2 = smov 127   ;;  %v196_v33 = vmul.f32 0.8, %v22_v19  ;;  %p2025_p1 = scmp.lt.s32.totalorder %s1300_s14, %s1300_s14 }
   0xa   :  { %v2150_v23 = vpack.c.bf16 %v38_v22, %v37_v21  ;;  %v2160_v26 = vpack.c.bf16 %v40_v25, %v39_v24  ;;  %v2170_v28 = vld [vmem:[%s2387_s3] sm:$0x1]  ;;  %v1314_v45 = vld [vmem:[%s2384_s0 + $0x8] sm:$0xff]  ;;  %v1317_v56 = vld [vmem:[%s2384_s0 + $0x10] sm:$0xff]  ;;  %s2020_s15 = scalar_lea.vmem %s1300_s14, 1024 }
   0xb   :  { %1521 = vmatpush3.msk.msra.mxu1 %vm122_vm1, %v2170_v28  ;;  %v197_v34 = vld [vmem:[%s2384_s0] sm:$0xff]  ;;  %v1320_v5 = vld [vmem:[%s2384_s0 + $0x18] sm:$0xff]  ;;  %p2021_p0 = scmp.ne.s32.totalorder %s1300_s14, %s2020_s15  ;;  %p2026_p2 = scmp.lt.s32.totalorder %s2020_s15, %s2020_s15 }
   0xc   :  { %1813 = vmatpush3.bf16.msra.mxu0 %v2107_v10  ;;  %1829 = vmatprep.subr.bf16.mxu1 %v2044_v3  ;;  %v198_v35 = vadd.f32 %v197_v34, %v196_v33  ;;  %v1323_v22 = vld [vmem:[%s2384_s0 + $0x20] sm:$0xff] }
   0xd   :  { %1814 = vmatprep.subr.bf16.mxu0 %v2044_v3  ;;  %p2027_p3 = por %p2026_p2, %p2025_p1 }
   0xf   :  { %p2028_p4 = pnand %p2027_p3, %p2021_p0 }
  0x10   :  { %1816 = vmatpush3.bf16.msra.mxu0 %v2117_v13 }
  0x11   :  { %1817 = vmatprep.subr.bf16.mxu0 %v2044_v3 }
  0x13   :  { %v2005_v27 = vpop.eup %2004 }
  0x14   :  { %1819 = vmatpush3.bf16.msra.mxu0 %v2127_v16 }
  0x15   :  { %1820 = vmatprep.subr.bf16.mxu0 %v2044_v3 }
  0x18   :  { %1822 = vmatpush3.bf16.msra.mxu0 %v2140_v20 }
  0x19   :  { %1823 = vmatprep.subr.bf16.mxu0 %v2044_v3 }
  0x1c   :  { %1825 = vmatpush3.bf16.msra.mxu0 %v2150_v23 }
  0x1d   :  { %1826 = vmatprep.subr.bf16.mxu0 %v2044_v3 }
  0x20   :  { %1828 = vmatpush3.bf16.msra.mxu0 %v2160_v26 }
  0x21   :  { %1560 = vmatprep.subr.mxu0 %v2046_v6 }
  0x23   :  { %1518 = vmatmul.mubr.f32.vlgmr.msra.gmra.mrb[0].mxu0 %v2005_v27 }
  0x24   :  { %1562 = vmatprep.mubr.msk.f32.mxu0 %vm2045_vm0, %v2046_v6  ;;  %1561 = vmatpush3.msk.msra.mxu0 %vm122_vm1, %v2170_v28 }
  0x25   :  { %1600 = vmatprep.subr.mxu0 %v2046_v6 }
  0xf6   :  { %v109_v29 = vpop.f32.mrb[0].mxu0 }
  0xf7   :  { %114 = vrot.lane.b32.xlu0 %v109_v29, %s2047_s2  ;;  %v1519_v30 = vpop.f32.mrb[1].mxu0 }
 0x169   :  { %v115_v31 = vpop.permute.xlu0 %114 }
 0x16a   :  { %v117_v32 = vmul.f32 %v115_v31, %v109_v29 }
 0x16c   :  { %1523 = vmatmul.mubr.msk.f32.vlgmr.msra.gmra.mrb[0].mxu1 %vm118_vm2, %v117_v32 }
 0x16d   :  { %1831 = vmatpush3.bf16.msra.mxu1 %v2086_v4  ;;  %1557 = vmatprep.mubr.msk.f32.mxu1 %vm2045_vm0, %v2046_v6 }
 0x16e   :  { %1832 = vmatprep.subr.bf16.mxu1 %v2044_v3 }
 0x171   :  { %1834 = vmatpush3.bf16.msra.mxu1 %v2097_v7 }
 0x172   :  { %1835 = vmatprep.subr.bf16.mxu1 %v2044_v3 }
 0x175   :  { %1837 = vmatpush3.bf16.msra.mxu1 %v2107_v10 }
 0x176   :  { %1838 = vmatprep.subr.bf16.mxu1 %v2044_v3 }
 0x179   :  { %1840 = vmatpush3.bf16.msra.mxu1 %v2117_v13 }
 0x17a   :  { %1841 = vmatprep.subr.bf16.mxu1 %v2044_v3 }
 0x17d   :  { %1843 = vmatpush3.bf16.msra.mxu1 %v2127_v16 }
 0x17e   :  { %1844 = vmatprep.subr.bf16.mxu1 %v2044_v3 }
 0x181   :  { %1846 = vmatpush3.bf16.msra.mxu1 %v2140_v20 }
 0x182   :  { %1847 = vmatprep.subr.bf16.mxu1 %v2044_v3 }
 0x185   :  { %1849 = vmatpush3.bf16.msra.mxu1 %v2150_v23 }
 0x186   :  { %1850 = vmatprep.subr.bf16.mxu1 %v2044_v3 }
 0x189   :  { %1852 = vmatpush3.bf16.msra.mxu1 %v2160_v26 }
 0x18a   :  { %1853 = vmatprep.subr.bf16.mxu1 %v2044_v3 }
 0x23f   :  { %v192_v36 = vpop.f32.mrb[0].mxu1 }
 0x240   :  { %v199_v37 = vadd.f32 %v198_v35, %v192_v36  ;;  %v1524_v38 = vpop.f32.mrb[1].mxu1  ;;  %v1326_v36 = vld [vmem:[%s2384_s0 + $0x28] sm:$0xff] }
 0x242   :  { %200 = vst [vmem:[#allocation3] sm:$0xff] %v199_v37  ;;  %2006 = vtanh.f32 %v199_v37  ;;  %v350_v44 = vmul.f32 0.8, %v199_v37 }
 0x244   :  { %v353_v46 = vadd.f32 %v1314_v45, %v350_v44 }
 0x24c   :  { %v2007_v39 = vpop.eup %2006 }
 0x24d   :  { %1558 = vmatmul.mubr.f32.vlgmr.msra.gmra.mrb[2].mxu1 %v2007_v39 }
 0x24e   :  { %1855 = vmatpush3.bf16.msra.mxu1 %v2086_v4  ;;  %1597 = vmatprep.mubr.msk.f32.mxu1 %vm2045_vm0, %v2046_v6 }
 0x24f   :  { %1856 = vmatprep.subr.bf16.mxu1 %v2044_v3 }
 0x252   :  { %1858 = vmatpush3.bf16.msra.mxu1 %v2097_v7 }
 0x253   :  { %1859 = vmatprep.subr.bf16.mxu1 %v2044_v3 }
 0x256   :  { %1861 = vmatpush3.bf16.msra.mxu1 %v2107_v10 }
 0x257   :  { %1862 = vmatprep.subr.bf16.mxu1 %v2044_v3 }
 0x25a   :  { %1864 = vmatpush3.bf16.msra.mxu1 %v2117_v13 }
 0x25b   :  { %1865 = vmatprep.subr.bf16.mxu1 %v2044_v3 }
 0x25e   :  { %1867 = vmatpush3.bf16.msra.mxu1 %v2127_v16 }
 0x25f   :  { %1868 = vmatprep.subr.bf16.mxu1 %v2044_v3 }
 0x262   :  { %1870 = vmatpush3.bf16.msra.mxu1 %v2140_v20 }
 0x263   :  { %1871 = vmatprep.subr.bf16.mxu1 %v2044_v3 }
 0x266   :  { %1873 = vmatpush3.bf16.msra.mxu1 %v2150_v23 }
 0x267   :  { %1874 = vmatprep.subr.bf16.mxu1 %v2044_v3 }
 0x26a   :  { %1876 = vmatpush3.bf16.msra.mxu1 %v2160_v26 }
 0x26b   :  { %1640 = vmatprep.subr.mxu1 %v2046_v6 }
 0x320   :  { %v268_v40 = vpop.f32.mrb[2].mxu1 }
 0x321   :  { %273 = vrot.lane.b32.xlu0 %v268_v40, %s2047_s2  ;;  %v1559_v41 = vpop.f32.mrb[3].mxu1 }
 0x393   :  { %v274_v42 = vpop.permute.xlu0 %273 }
 0x394   :  { %v276_v43 = vmul.f32 %v274_v42, %v268_v40 }
 0x396   :  { %1563 = vmatmul.mubr.msk.f32.vlgmr.msra.gmra.mrb[2].mxu0 %vm118_vm2, %v276_v43 }
 0x397   :  { %1601 = vmatpush3.msk.msra.mxu0 %vm122_vm1, %v2170_v28  ;;  %1602 = vmatprep.mubr.msk.f32.mxu0 %vm2045_vm0, %v2046_v6 }
 0x398   :  { %1877 = vmatprep.subr.bf16.mxu0 %v2044_v3 }
 0x469   :  { %v346_v47 = vpop.f32.mrb[2].mxu0 }
 0x46a   :  { %v354_v48 = vadd.f32 %v353_v46, %v346_v47  ;;  %v1564_v49 = vpop.f32.mrb[3].mxu0  ;;  %v1332_v47 = vld [vmem:[%s2384_s0 + $0x38] sm:$0xff] }
 0x46c   :  { %356 = vst [vmem:[#allocation3 + $0x8] sm:$0xff] %v354_v48  ;;  %2008 = vtanh.f32 %v354_v48  ;;  %v506_v55 = vmul.f32 0.8, %v354_v48 }
 0x46e   :  { %v509_v57 = vadd.f32 %v1317_v56, %v506_v55 }
 0x476   :  { %v2009_v50 = vpop.eup %2008 }
 0x477   :  { %1598 = vmatmul.mubr.f32.vlgmr.msra.gmra.mrb[4].mxu1 %v2009_v50 }
 0x478   :  { %1641 = vmatpush3.msk.msra.mxu1 %vm122_vm1, %v2170_v28  ;;  %1642 = vmatprep.mubr.msk.f32.mxu1 %vm2045_vm0, %v2046_v6 }
 0x479   :  { %1901 = vmatprep.subr.bf16.mxu1 %v2044_v3 }
 0x54a   :  { %v424_v51 = vpop.f32.mrb[4].mxu1 }
 0x54b   :  { %429 = vrot.lane.b32.xlu1 %v424_v51, %s2047_s2  ;;  %v1599_v52 = vpop.f32.mrb[5].mxu1 }
 0x5bd   :  { %v430_v53 = vpop.permute.xlu1 %429 }
 0x5be   :  { %v432_v54 = vmul.f32 %v430_v53, %v424_v51 }
 0x5c0   :  { %1603 = vmatmul.mubr.msk.f32.vlgmr.msra.gmra.mrb[4].mxu0 %vm118_vm2, %v432_v54 }
 0x5c1   :  { %1879 = vmatpush3.bf16.msra.mxu0 %v2086_v4  ;;  %1637 = vmatprep.mubr.msk.f32.mxu0 %vm2045_vm0, %v2046_v6 }
 0x5c2   :  { %1880 = vmatprep.subr.bf16.mxu0 %v2044_v3 }
 0x5c5   :  { %1882 = vmatpush3.bf16.msra.mxu0 %v2097_v7 }
 0x5c6   :  { %1883 = vmatprep.subr.bf16.mxu0 %v2044_v3 }
 0x5c9   :  { %1885 = vmatpush3.bf16.msra.mxu0 %v2107_v10 }
 0x5ca   :  { %1886 = vmatprep.subr.bf16.mxu0 %v2044_v3 }
 0x5cd   :  { %1888 = vmatpush3.bf16.msra.mxu0 %v2117_v13 }
 0x5ce   :  { %1889 = vmatprep.subr.bf16.mxu0 %v2044_v3 }
 0x5d1   :  { %1891 = vmatpush3.bf16.msra.mxu0 %v2127_v16 }
 0x5d2   :  { %1892 = vmatprep.subr.bf16.mxu0 %v2044_v3 }
 0x5d5   :  { %1894 = vmatpush3.bf16.msra.mxu0 %v2140_v20 }
 0x5d6   :  { %1895 = vmatprep.subr.bf16.mxu0 %v2044_v3 }
 0x5d9   :  { %1897 = vmatpush3.bf16.msra.mxu0 %v2150_v23 }
 0x5da   :  { %1898 = vmatprep.subr.bf16.mxu0 %v2044_v3 }
 0x5dd   :  { %1900 = vmatpush3.bf16.msra.mxu0 %v2160_v26 }
 0x5de   :  { %1680 = vmatprep.subr.mxu0 %v2046_v6 }
 0x693   :  { %v502_v58 = vpop.f32.mrb[4].mxu0 }
 0x694   :  { %v510_v59 = vadd.f32 %v509_v57, %v502_v58  ;;  %v1604_v60 = vpop.f32.mrb[5].mxu0 }
 0x696   :  { %512 = vst [vmem:[#allocation3 + $0x10] sm:$0xff] %v510_v59  ;;  %2010 = vtanh.f32 %v510_v59  ;;  %v662_v2 = vmul.f32 0.8, %v510_v59 }
 0x698   :  { %v665_v8 = vadd.f32 %v1320_v5, %v662_v2 }
 0x6a0   :  { %v2011_v61 = vpop.eup %2010 }
 0x6a1   :  { %1638 = vmatmul.mubr.f32.vlgmr.msra.gmra.mrb[6].mxu0 %v2011_v61 }
 0x6a2   :  { %1681 = vmatpush3.msk.msra.mxu0 %vm122_vm1, %v2170_v28  ;;  %1682 = vmatprep.mubr.msk.f32.mxu0 %vm2045_vm0, %v2046_v6 }
 0x6a3   :  { %1925 = vmatprep.subr.bf16.mxu0 %v2044_v3 }
 0x774   :  { %v580_v62 = vpop.f32.mrb[6].mxu0 }
 0x775   :  { %585 = vrot.lane.b32.xlu1 %v580_v62, %s2047_s2  ;;  %v1639_v63 = vpop.f32.mrb[7].mxu0 }
 0x7e7   :  { %v586_v0 = vpop.permute.xlu1 %585 }
 0x7e8   :  { %v588_v1 = vmul.f32 %v586_v0, %v580_v62 }
 0x7ea   :  { %1643 = vmatmul.mubr.msk.f32.vlgmr.msra.gmra.mrb[6].mxu1 %vm118_vm2, %v588_v1 }
 0x7eb   :  { %1903 = vmatpush3.bf16.msra.mxu1 %v2086_v4  ;;  %1677 = vmatprep.mubr.msk.f32.mxu1 %vm2045_vm0, %v2046_v6 }
 0x7ec   :  { %1904 = vmatprep.subr.bf16.mxu1 %v2044_v3 }
 0x7ef   :  { %1906 = vmatpush3.bf16.msra.mxu1 %v2097_v7 }
 0x7f0   :  { %1907 = vmatprep.subr.bf16.mxu1 %v2044_v3 }
 0x7f3   :  { %1909 = vmatpush3.bf16.msra.mxu1 %v2107_v10 }
 0x7f4   :  { %1910 = vmatprep.subr.bf16.mxu1 %v2044_v3 }
 0x7f7   :  { %1912 = vmatpush3.bf16.msra.mxu1 %v2117_v13 }
 0x7f8   :  { %1913 = vmatprep.subr.bf16.mxu1 %v2044_v3 }
 0x7fb   :  { %1915 = vmatpush3.bf16.msra.mxu1 %v2127_v16 }
 0x7fc   :  { %1916 = vmatprep.subr.bf16.mxu1 %v2044_v3 }
 0x7ff   :  { %1918 = vmatpush3.bf16.msra.mxu1 %v2140_v20 }
 0x800   :  { %1919 = vmatprep.subr.bf16.mxu1 %v2044_v3 }
 0x803   :  { %1921 = vmatpush3.bf16.msra.mxu1 %v2150_v23 }
 0x804   :  { %1922 = vmatprep.subr.bf16.mxu1 %v2044_v3 }
 0x807   :  { %1924 = vmatpush3.bf16.msra.mxu1 %v2160_v26 }
 0x808   :  { %1720 = vmatprep.subr.mxu1 %v2046_v6 }
 0x8bd   :  { %v658_v9 = vpop.f32.mrb[6].mxu1 }
 0x8be   :  { %v666_v11 = vadd.f32 %v665_v8, %v658_v9  ;;  %v1644_v12 = vpop.f32.mrb[7].mxu1 }
 0x8c0   :  { %668 = vst [vmem:[#allocation3 + $0x18] sm:$0xff] %v666_v11  ;;  %2012 = vtanh.f32 %v666_v11  ;;  %v818_v21 = vmul.f32 0.8, %v666_v11 }
 0x8c2   :  { %v821_v24 = vadd.f32 %v1323_v22, %v818_v21 }
 0x8ca   :  { %v2013_v14 = vpop.eup %2012 }
 0x8cb   :  { %1678 = vmatmul.mubr.f32.vlgmr.msra.gmra.mrb[8].mxu1 %v2013_v14 }
 0x8cc   :  { %1721 = vmatpush3.msk.msra.mxu1 %vm122_vm1, %v2170_v28  ;;  %1722 = vmatprep.mubr.msk.f32.mxu1 %vm2045_vm0, %v2046_v6 }
 0x8cd   :  { %1949 = vmatprep.subr.bf16.mxu1 %v2044_v3 }
 0x99e   :  { %v736_v15 = vpop.f32.mrb[8].mxu1 }
 0x99f   :  { %741 = vrot.lane.b32.xlu0 %v736_v15, %s2047_s2  ;;  %v1679_v17 = vpop.f32.mrb[9].mxu1 }
 0xa11   :  { %v742_v18 = vpop.permute.xlu0 %741 }
 0xa12   :  { %v744_v19 = vmul.f32 %v742_v18, %v736_v15 }
 0xa14   :  { %1683 = vmatmul.mubr.msk.f32.vlgmr.msra.gmra.mrb[8].mxu0 %vm118_vm2, %v744_v19 }
 0xa15   :  { %1927 = vmatpush3.bf16.msra.mxu0 %v2086_v4  ;;  %1717 = vmatprep.mubr.msk.f32.mxu0 %vm2045_vm0, %v2046_v6 }
 0xa16   :  { %1928 = vmatprep.subr.bf16.mxu0 %v2044_v3 }
 0xa19   :  { %1930 = vmatpush3.bf16.msra.mxu0 %v2097_v7 }
 0xa1a   :  { %1931 = vmatprep.subr.bf16.mxu0 %v2044_v3 }
 0xa1d   :  { %1933 = vmatpush3.bf16.msra.mxu0 %v2107_v10 }
 0xa1e   :  { %1934 = vmatprep.subr.bf16.mxu0 %v2044_v3 }
 0xa21   :  { %1936 = vmatpush3.bf16.msra.mxu0 %v2117_v13 }
 0xa22   :  { %1937 = vmatprep.subr.bf16.mxu0 %v2044_v3 }
 0xa25   :  { %1939 = vmatpush3.bf16.msra.mxu0 %v2127_v16 }
 0xa26   :  { %1940 = vmatprep.subr.bf16.mxu0 %v2044_v3 }
 0xa29   :  { %1942 = vmatpush3.bf16.msra.mxu0 %v2140_v20 }
 0xa2a   :  { %1943 = vmatprep.subr.bf16.mxu0 %v2044_v3 }
 0xa2d   :  { %1945 = vmatpush3.bf16.msra.mxu0 %v2150_v23 }
 0xa2e   :  { %1946 = vmatprep.subr.bf16.mxu0 %v2044_v3 }
 0xa31   :  { %1948 = vmatpush3.bf16.msra.mxu0 %v2160_v26 }
 0xa32   :  { %1760 = vmatprep.subr.mxu0 %v2046_v6 }
 0xae7   :  { %v814_v25 = vpop.f32.mrb[8].mxu0 }
 0xae8   :  { %v822_v27 = vadd.f32 %v821_v24, %v814_v25  ;;  %v1684_v29 = vpop.f32.mrb[9].mxu0 }
 0xaea   :  { %824 = vst [vmem:[#allocation3 + $0x20] sm:$0xff] %v822_v27  ;;  %2014 = vtanh.f32 %v822_v27  ;;  %v974_v35 = vmul.f32 0.8, %v822_v27 }
 0xaec   :  { %v977_v37 = vadd.f32 %v1326_v36, %v974_v35 }
 0xaf4   :  { %v2015_v30 = vpop.eup %2014 }
 0xaf5   :  { %1718 = vmatmul.mubr.f32.vlgmr.msra.gmra.mrb[10].mxu0 %v2015_v30 }
 0xaf6   :  { %1761 = vmatpush3.msk.msra.mxu0 %vm122_vm1, %v2170_v28  ;;  %1762 = vmatprep.mubr.msk.f32.mxu0 %vm2045_vm0, %v2046_v6 }
 0xaf7   :  { %1973 = vmatprep.subr.bf16.mxu0 %v2044_v3 }
 0xbc8   :  { %v892_v31 = vpop.f32.mrb[10].mxu0 }
 0xbc9   :  { %897 = vrot.lane.b32.xlu1 %v892_v31, %s2047_s2  ;;  %v1719_v32 = vpop.f32.mrb[11].mxu0 }
 0xc3b   :  { %v898_v33 = vpop.permute.xlu1 %897 }
 0xc3c   :  { %v900_v34 = vmul.f32 %v898_v33, %v892_v31 }
 0xc3e   :  { %1723 = vmatmul.mubr.msk.f32.vlgmr.msra.gmra.mrb[10].mxu1 %vm118_vm2, %v900_v34 }
 0xc3f   :  { %1951 = vmatpush3.bf16.msra.mxu1 %v2086_v4  ;;  %1757 = vmatprep.mubr.msk.f32.mxu1 %vm2045_vm0, %v2046_v6 }
 0xc40   :  { %1952 = vmatprep.subr.bf16.mxu1 %v2044_v3 }
 0xc43   :  { %1954 = vmatpush3.bf16.msra.mxu1 %v2097_v7 }
 0xc44   :  { %1955 = vmatprep.subr.bf16.mxu1 %v2044_v3 }
 0xc47   :  { %1957 = vmatpush3.bf16.msra.mxu1 %v2107_v10 }
 0xc48   :  { %1958 = vmatprep.subr.bf16.mxu1 %v2044_v3 }
 0xc4b   :  { %1960 = vmatpush3.bf16.msra.mxu1 %v2117_v13 }
 0xc4c   :  { %1961 = vmatprep.subr.bf16.mxu1 %v2044_v3 }
 0xc4f   :  { %1963 = vmatpush3.bf16.msra.mxu1 %v2127_v16 }
 0xc50   :  { %1964 = vmatprep.subr.bf16.mxu1 %v2044_v3 }
 0xc53   :  { %1966 = vmatpush3.bf16.msra.mxu1 %v2140_v20 }
 0xc54   :  { %1967 = vmatprep.subr.bf16.mxu1 %v2044_v3 }
 0xc57   :  { %1969 = vmatpush3.bf16.msra.mxu1 %v2150_v23 }
 0xc58   :  { %1970 = vmatprep.subr.bf16.mxu1 %v2044_v3 }
 0xc5b   :  { %1972 = vmatpush3.bf16.msra.mxu1 %v2160_v26 }
 0xc5c   :  { %1800 = vmatprep.subr.mxu1 %v2046_v6 }
 0xd11   :  { %v970_v38 = vpop.f32.mrb[10].mxu1 }
 0xd12   :  { %v978_v39 = vadd.f32 %v977_v37, %v970_v38  ;;  %v1724_v40 = vpop.f32.mrb[11].mxu1 }
 0xd14   :  { %980 = vst [vmem:[#allocation3 + $0x28] sm:$0xff] %v978_v39  ;;  %2016 = vtanh.f32 %v978_v39 }
 0xd1e   :  { %v2017_v41 = vpop.eup %2016 }
 0xd1f   :  { %1758 = vmatmul.mubr.f32.vlgmr.msra.gmra.mrb[12].mxu1 %v2017_v41 }
 0xd20   :  { %1801 = vmatpush3.msk.msra.mxu1 %vm122_vm1, %v2170_v28  ;;  %1802 = vmatprep.mubr.msk.f32.mxu1 %vm2045_vm0, %v2046_v6 }
 0xdf2   :  { %v1048_v42 = vpop.f32.mrb[12].mxu1 }
 0xdf3   :  { %1053 = vrot.lane.b32.xlu0 %v1048_v42, %s2047_s2  ;;  %v1759_v43 = vpop.f32.mrb[13].mxu1 }
 0xe65   :  { %v1054_v44 = vpop.permute.xlu0 %1053 }
 0xe66   :  { %v1056_v45 = vmul.f32 %v1054_v44, %v1048_v42 }
 0xe68   :  { %1763 = vmatmul.mubr.msk.f32.vlgmr.msra.gmra.mrb[12].mxu0 %vm118_vm2, %v1056_v45 }
 0xe69   :  { %1975 = vmatpush3.bf16.msra.mxu0 %v2086_v4  ;;  %1797 = vmatprep.mubr.msk.f32.mxu0 %vm2045_vm0, %v2046_v6  ;;  %v1130_v4 = vmul.f32 0.8, %v978_v39  ;;  %v1329_v6 = vld [vmem:[%s2384_s0 + $0x30] sm:$0xff] }
 0xe6a   :  { %1976 = vmatprep.subr.bf16.mxu0 %v2044_v3 }
 0xe6d   :  { %1978 = vmatpush3.bf16.msra.mxu0 %v2097_v7  ;;  %v1133_v7 = vadd.f32 %v1329_v6, %v1130_v4 }
 0xe6e   :  { %1979 = vmatprep.subr.bf16.mxu0 %v2044_v3 }
 0xe71   :  { %1981 = vmatpush3.bf16.msra.mxu0 %v2107_v10 }
 0xe72   :  { %1982 = vmatprep.subr.bf16.mxu0 %v2044_v3 }
 0xe75   :  { %1984 = vmatpush3.bf16.msra.mxu0 %v2117_v13 }
 0xe76   :  { %1985 = vmatprep.subr.bf16.mxu0 %v2044_v3 }
 0xe79   :  { %1987 = vmatpush3.bf16.msra.mxu0 %v2127_v16 }
 0xe7a   :  { %1988 = vmatprep.subr.bf16.mxu0 %v2044_v3 }
 0xe7d   :  { %1990 = vmatpush3.bf16.msra.mxu0 %v2140_v20 }
 0xe7e   :  { %1991 = vmatprep.subr.bf16.mxu0 %v2044_v3 }
 0xe81   :  { %1993 = vmatpush3.bf16.msra.mxu0 %v2150_v23 }
 0xe82   :  { %1994 = vmatprep.subr.bf16.mxu0 %v2044_v3 }
 0xe85   :  { %1996 = vmatpush3.bf16.msra.mxu0 %v2160_v26 }
 0xf3b   :  { %v1126_v10 = vpop.f32.mrb[12].mxu0 }
 0xf3c   :  { %v1134_v13 = vadd.f32 %v1133_v7, %v1126_v10  ;;  %v1764_v16 = vpop.f32.mrb[13].mxu0 }
 0xf3e   :  { %1136 = vst [vmem:[#allocation3 + $0x30] sm:$0xff] %v1134_v13  ;;  %2018 = vtanh.f32 %v1134_v13  ;;  %v1286_v26 = vmul.f32 0.8, %v1134_v13 }
 0xf40   :  { %v1289_v48 = vadd.f32 %v1332_v47, %v1286_v26 }
 0xf48   :  { %v2019_v20 = vpop.eup %2018 }
 0xf49   :  { %1798 = vmatmul.mubr.f32.vlgmr.msra.gmra.mrb[14].mxu0 %v2019_v20 }
0x101c   :  { %v1204_v28 = vpop.f32.mrb[14].mxu0 }
0x101d   :  { %1209 = vrot.lane.b32.xlu1 %v1204_v28, %s2047_s2  ;;  %v1799_v23 = vpop.f32.mrb[15].mxu0 }
0x108f   :  { %v1210_v3 = vpop.permute.xlu1 %1209 }
0x1090   :  { %v1212_v46 = vmul.f32 %v1210_v3, %v1204_v28 }
0x1092   :  { %1803 = vmatmul.mubr.msk.f32.vlgmr.msra.gmra.mrb[14].mxu1 %vm118_vm2, %v1212_v46 }
0x1165   :  { %v1282_v49 = vpop.f32.mrb[14].mxu1 }
0x1166   :  { %v1290_v50 = vadd.f32 %v1289_v48, %v1282_v49  ;;  %v1804_v51 = vpop.f32.mrb[15].mxu1 }
0x1168   :  { %1292 = vst [vmem:[#allocation3 + $0x38] sm:$0xff] %v1290_v50 }
0x1169   :  { %2031 = shalt.err (!%p2028_p4)
}
0x116a   :  { %s2032_s18 = scalar_lea.hbm %s2388_s4, 1024 }
0x116b   :  { %p2033_p5 = scmp.ne.s32.totalorder %s2388_s4, %s2032_s18  ;;  %p2036_p6 = scmp.lt.u32.totalorder %s2032_s18, %s2388_s4 }
0x116d   :  { %p2038_p7 = pnand %p2036_p6, %p2033_p5 }
0x116f   :  { %2041 = shalt.err (!%p2038_p7)
}
0x1170   :  { %s2049_s21 = smov 128   ;;  %s2050_s22 = smov 8  }
0x1171   :  { %1305 = dma.vmem_to_hbm [thread:$0]  %s1300_s14, 1024, %s2388_s4, [#allocation4], %s2049_s21, %s2049_s21, %s2050_s22  }
0x1172   :  { %2042 = dma.done.wait [#allocation4], 1024  }
0x1173   :  { %2043 = vsyncadd [#allocation4], 4294966272 }
0x1174   :  { %1309 = vsyncpa [#allocation4], 1 }

</bundles_post_ra>
